<compile_context>
chip_gen: v7x
topology: tpu7x:2x2x1
jax: 0.10.0
libtpu: 0.0.40
codegen_flags: <defaults>
</compile_context>

<pallas_src>
import math

import jax
import jax.numpy as jnp
from jax import lax
from jax.experimental import pallas as pl
from jax.experimental.pallas import tpu as pltpu


def _round_up(v, m):
    return ((v + m - 1) // m) * m


def _network_kernel(x_ref, wb_ref, wct_ref, out_ref, acc_ref):
    """One K-tile of the fused backbone + CosineLinear forward.

    x_ref   : VMEM (B_pad, tk)      bf16  K-tile of flattened input
    wb_ref  : VMEM (tk, D_pad)      bf16  K-tile of backbone weight
    wct_ref : VMEM (D_pad, N_pad)   f32   pre-normalized, sigma-folded Wc^T
    out_ref : VMEM (B_pad, N_pad)   f32   logits slab (written on last tile)
    acc_ref : VMEM (B_pad, D_pad)   f32   feature accumulator scratch
    """
    k = pl.program_id(0)

    @pl.when(k == 0)
    def _():
        acc_ref[...] = jnp.zeros_like(acc_ref)

    # ---- backbone partial: acc += x_tile @ Wb_tile  (bf16 MXU, f32 acc) ----
    acc_ref[...] += jnp.dot(x_ref[...], wb_ref[...],
                            preferred_element_type=jnp.float32)

    @pl.when(k == pl.num_programs(0) - 1)
    def _():
        feats = acc_ref[...]                                   # f32 (B_pad, D_pad)
        # F.normalize(t, dim=1): t / max(||t||, eps), eps=1e-12.
        # rsqrt(max(sumsq, eps^2)) == 1 / max(||t||, eps); rsqrt goes to the EUP.
        eps2 = jnp.float32(1e-24)
        inv_norm = lax.rsqrt(
            jnp.maximum(jnp.sum(feats * feats, axis=1, keepdims=True), eps2))
        f_hat = feats * inv_norm                               # keep f32

        # cosine logits: f_hat @ (sigma * normalize(Wc)).T — tiny matmul, f32
        # for accuracy of the small class margins.
        out_ref[...] = jnp.dot(f_hat, wct_ref[...],
                               preferred_element_type=jnp.float32)


def prepare_weights(wb, wc, sigma, *, tk=None, b_pad_hint=16,
                    stream_vmem_budget_bytes=16 << 20):
    """One-time weight-side prep (hoisted out of the per-call path).

    wb: [Din, D] backbone weight; wc: [N, D] CosineLinear weight; sigma: (1,).
    Returns (wb_p bf16 [K_pad, D_pad], wct_p f32 [D_pad, N_pad], tk).
    Re-run only when weights change (e.g. update_classifer).
    """
    din, d = wb.shape
    num_classes = wc.shape[0]
    d_pad = _round_up(max(d, 128), 128)
    n_pad = _round_up(max(num_classes, 128), 128)
    b_pad = _round_up(max(b_pad_hint, 16), 16)

    # K-tile: multiple of 128, big enough to amortize per-step overhead,
    # small enough that double-buffered bf16 x+wb tiles fit the streaming
    # budget (conservative for v5e's 16 MiB scoped VMEM / v7x's 64 MiB phys).
    if tk is None:
        tk_cap = stream_vmem_budget_bytes // (2 * 2 * (d_pad + b_pad))
        tk = min(4096, max(128, (tk_cap // 128) * 128))
    tk = max(128, (int(tk) // 128) * 128)
    tk = min(tk, _round_up(din, 128))
    k_pad = _round_up(din, tk)

    # Backbone weight: zero-padded, bf16 for the MXU.
    # TODO(synk): on v7x consider fp8 Wb with a per-tile scale to halve the
    # dominant HBM weight stream.
    wb_p = (jnp.zeros((k_pad, d_pad), jnp.bfloat16)
            .at[:din, :d].set(wb.astype(jnp.bfloat16)))

    # Classifier weight: normalize rows in f32, fold sigma, pre-transpose so
    # the kernel has no in-kernel .T / XLU relayout. Kept f32 (tiny).
    eps = jnp.float32(1e-12)
    wcf = wc.astype(jnp.float32)
    w_hat = wcf / jnp.maximum(
        jnp.sqrt(jnp.sum(wcf * wcf, axis=1, keepdims=True)), eps)
    w_hat = w_hat * sigma.astype(jnp.float32)[0]
    wct_p = (jnp.zeros((d_pad, n_pad), jnp.float32)
             .at[:d, :num_classes].set(w_hat.T))

    return wb_p, wct_p, tk


def network_forward(x_nchw, wb_p, wct_p, tk, num_classes):
    """x_nchw: [B, C, H, W] f32; wb_p/wct_p/tk from prepare_weights.

    Returns logits [B, num_classes] f32.
    """
    B = x_nchw.shape[0]
    din = x_nchw.shape[1] * x_nchw.shape[2] * x_nchw.shape[3]
    k_pad, d_pad = wb_p.shape
    n_pad = wct_p.shape[1]
    assert k_pad % tk == 0 and din <= k_pad
    k_tiles = k_pad // tk

    # bf16 packs (16,128) per native tile -> pad B to 16.
    b_pad = _round_up(max(B, 16), 16)

    # Activation path: cast to bf16 first, then zero-pad (no f32 padded copy).
    x_flat = x_nchw.reshape(B, din).astype(jnp.bfloat16)
    x_p = jnp.zeros((b_pad, k_pad), jnp.bfloat16).at[:B, :din].set(x_flat)

    # Explicit VMEM limit sized from the actual buffers (double-buffered
    # x/wb/wct/out + f32 accumulator), with headroom; stays well under v7x's
    # 64 MiB physical and v5e's scoped default territory.
    vmem_est = (2 * b_pad * tk * 2          # x K-tiles, bf16, double-buffered
                + 2 * tk * d_pad * 2        # wb K-tiles, bf16, double-buffered
                + 2 * d_pad * n_pad * 4     # resident wct (f32)
                + 2 * b_pad * n_pad * 4     # output slab
                + b_pad * d_pad * 4)        # accumulator scratch
    vmem_limit = int(min(max(2 * vmem_est, 8 << 20), 48 << 20))

    cost = pl.CostEstimate(
        flops=2 * b_pad * k_pad * d_pad + 2 * b_pad * d_pad * n_pad,
        transcendentals=b_pad,
        bytes_accessed=(x_p.size * 2 + wb_p.size * 2 + wct_p.size * 4
                        + b_pad * n_pad * 4),
    )

    # TODO(synk): for very large Din*D on v7x, add a leading "parallel" axis
    # over D blocks so both TensorCores stream disjoint halves of Wb.
    out_padded = pl.pallas_call(
        _network_kernel,
        out_shape=jax.ShapeDtypeStruct((b_pad, n_pad), jnp.float32),
        grid_spec=pltpu.PrefetchScalarGridSpec(
            num_scalar_prefetch=0,
            grid=(k_tiles,),
            in_specs=[
                pl.BlockSpec((b_pad, tk), lambda k: (0, k)),      # x K-tile
                pl.BlockSpec((tk, d_pad), lambda k: (k, 0)),      # wb K-tile
                pl.BlockSpec((d_pad, n_pad), lambda k: (0, 0)),   # wct (resident)
            ],
            out_specs=pl.BlockSpec((b_pad, n_pad), lambda k: (0, 0)),
            scratch_shapes=[pltpu.VMEM((b_pad, d_pad), jnp.float32)],
        ),
        compiler_params=pltpu.CompilerParams(
            dimension_semantics=("arbitrary",),   # K is a reduction axis
            vmem_limit_bytes=vmem_limit,
        ),
        cost_estimate=cost,
    )(x_p, wb_p, wct_p)

    return out_padded[:B, :num_classes]


def _reference(x_nchw, wb, wc, sigma):
    B = x_nchw.shape[0]
    x_flat = x_nchw.reshape(B, -1).astype(jnp.float32)
    feats = x_flat @ wb
    eps = 1e-12
    f_hat = feats / jnp.maximum(
        jnp.linalg.norm(feats, axis=1, keepdims=True), eps)
    w_hat = wc / jnp.maximum(
        jnp.linalg.norm(wc, axis=1, keepdims=True), eps)
    return sigma[0] * (f_hat @ w_hat.T)


if __name__ == "__main__":
    # Small shapes consistent with the module:
    #   batch=2, channels=4, spatial=16  ->  flattened Din = 4*16*16 = 1024
    #   embd_dim (feature_dim) = 32, num_classes = 10
    B, C, H, W = 2, 4, 16, 16
    embd_dim = 32
    num_classes = 10
    din = C * H * W

    key = jax.random.PRNGKey(0)
    kx, kb, kc = jax.random.split(key, 3)

    x = jax.random.normal(kx, (B, C, H, W), dtype=jnp.float32)

    # Synthetic deterministic backbone weight (flatten -> embd_dim linear).
    wb = jax.random.normal(kb, (din, embd_dim), dtype=jnp.float32) / math.sqrt(din)

    # CosineLinear.reset_parameters(): uniform(-stdv, stdv), stdv = 1/sqrt(in_features)
    stdv = 1.0 / math.sqrt(embd_dim)
    wc = jax.random.uniform(
        kc, (num_classes, embd_dim), dtype=jnp.float32, minval=-stdv, maxval=stdv)

    # sigma.data.fill_(1)
    sigma = jnp.ones((1,), dtype=jnp.float32)

    # TODO(synk): use_RP=True branch (input @ W_rand -> ReLU -> linear) is not
    # exercised here since __init__ leaves use_RP=False / W_rand=None.

    # One-time weight-side prep (would be cached / redone only at weight update).
    wb_p, wct_p, tk = prepare_weights(wb, wc, sigma, b_pad_hint=B)
    jax.block_until_ready((wb_p, wct_p))

    logits = network_forward(x, wb_p, wct_p, tk, num_classes)
    jax.block_until_ready(logits)

    ref = _reference(x, wb, wc, sigma)
    assert logits.shape == (B, num_classes)
    # bf16 MXU inputs on the Din reduction -> bf16-level tolerance vs f32 ref.
    assert jnp.allclose(logits, ref, atol=2e-2, rtol=2e-2), (
        f"max err {jnp.max(jnp.abs(logits - ref))}")

    print("KERNEL_OK")
</pallas_src>

<mosaic_0001>
module attributes {stable_mosaic.version = 11 : i64} {
  func.func @_network_kernel(%arg0: i32, %arg1: memref<16x1024xbf16, #tpu.memory_space<vmem>>, %arg2: memref<1024x128xbf16, #tpu.memory_space<vmem>>, %arg3: memref<128x128xf32, #tpu.memory_space<vmem>>, %arg4: memref<16x128xf32, #tpu.memory_space<vmem>>, %arg5: memref<16x128xf32, #tpu.memory_space<vmem>>) attributes {dimension_semantics = [#tpu.dimension_semantics<arbitrary>], iteration_bounds = array<i64: 1>, scalar_prefetch = 0 : i64, scratch_operands = 1 : i64, tpu.core_type = #tpu.core_type<tc>, window_params = [{transform_indices = @transform_0, window_bounds = array<i64: 16, 1024>}, {transform_indices = @transform_1, window_bounds = array<i64: 1024, 128>}, {pipeline_mode = #tpu.pipeline_mode<synchronous>, transform_indices = @transform_2, window_bounds = array<i64: 128, 128>}, {pipeline_mode = #tpu.pipeline_mode<synchronous>, transform_indices = @transform_3, window_bounds = array<i64: 16, 128>}]} {
    %c0_i32 = arith.constant 0 : i32
    %0 = arith.cmpi eq, %arg0, %c0_i32 : i32
    %1 = arith.extui %0 : i1 to i32
    %c0_i32_0 = arith.constant 0 : i32
    %2 = arith.cmpi ne, %1, %c0_i32_0 : i32
    scf.if %2 {
      %cst_10 = arith.constant 0.000000e+00 : f32
      %12 = vector.broadcast %cst_10 : f32 to vector<16x128xf32>
      %c0_11 = arith.constant 0 : index
      %c0_12 = arith.constant 0 : index
      %13 = vector.load %arg5[%c0_11, %c0_12] : memref<16x128xf32, #tpu.memory_space<vmem>>, vector<16x128xf32>
      tpu.vector_store %arg5[%c0_11, %c0_12], %12 {strides = array<i32>} : memref<16x128xf32, #tpu.memory_space<vmem>>, vector<16x128xf32>,
    } else {
    }
    %c0 = arith.constant 0 : index
    %c0_1 = arith.constant 0 : index
    %3 = vector.load %arg5[%c0, %c0_1] : memref<16x128xf32, #tpu.memory_space<vmem>>, vector<16x128xf32>
    %c0_2 = arith.constant 0 : index
    %c0_3 = arith.constant 0 : index
    %4 = vector.load %arg1[%c0_2, %c0_3] : memref<16x1024xbf16, #tpu.memory_space<vmem>>, vector<16x1024xbf16>
    %c0_4 = arith.constant 0 : index
    %c0_5 = arith.constant 0 : index
    %5 = vector.load %arg2[%c0_4, %c0_5] : memref<1024x128xbf16, #tpu.memory_space<vmem>>, vector<1024x128xbf16>
    %cst = arith.constant dense<0.000000e+00> : vector<16x128xf32>
    %6 = tpu.matmul %4, %5, %cst {dimension_numbers = #tpu.dot_dimension_numbers<[1], [0], [0], [1], [0, 0, 1, 1], [], []>} : vector<16x1024xbf16>, vector<1024x128xbf16>, vector<16x128xf32> -> vector<16x128xf32>
    %7 = arith.addf %3, %6 : vector<16x128xf32>
    %c0_6 = arith.constant 0 : index
    %c0_7 = arith.constant 0 : index
    %8 = vector.load %arg5[%c0_6, %c0_7] : memref<16x128xf32, #tpu.memory_space<vmem>>, vector<16x128xf32>
    tpu.vector_store %arg5[%c0_6, %c0_7], %7 {strides = array<i32>} : memref<16x128xf32, #tpu.memory_space<vmem>>, vector<16x128xf32>,
    %c0_i32_8 = arith.constant 0 : i32
    %9 = arith.cmpi eq, %arg0, %c0_i32_8 : i32
    %10 = arith.extui %9 : i1 to i32
    %c0_i32_9 = arith.constant 0 : i32
    %11 = arith.cmpi ne, %10, %c0_i32_9 : i32
    scf.if %11 {
      %c0_10 = arith.constant 0 : index
      %c0_11 = arith.constant 0 : index
      %12 = vector.load %arg5[%c0_10, %c0_11] : memref<16x128xf32, #tpu.memory_space<vmem>>, vector<16x128xf32>
      %13 = arith.mulf %12, %12 : vector<16x128xf32>
      %cst_12 = arith.constant dense<0.000000e+00> : vector<16xf32>
      %14 = vector.multi_reduction <add>, %13, %cst_12 [1] : vector<16x128xf32> to vector<16xf32>
      %15 = vector.shape_cast %14 : vector<16xf32> to vector<16x1xf32>
      %cst_13 = arith.constant 1.000000e-24 : f32
      %16 = vector.broadcast %cst_13 : f32 to vector<16x1xf32>
      %17 = arith.maximumf %15, %16 : vector<16x1xf32>
      %18 = math.rsqrt %17 : vector<16x1xf32>
      %19 = vector.broadcast %18 : vector<16x1xf32> to vector<16x128xf32>
      %20 = arith.mulf %12, %19 : vector<16x128xf32>
      %c0_14 = arith.constant 0 : index
      %c0_15 = arith.constant 0 : index
      %21 = vector.load %arg3[%c0_14, %c0_15] : memref<128x128xf32, #tpu.memory_space<vmem>>, vector<128x128xf32>
      %cst_16 = arith.constant dense<0.000000e+00> : vector<16x128xf32>
      %22 = tpu.matmul %20, %21, %cst_16 {dimension_numbers = #tpu.dot_dimension_numbers<[1], [0], [0], [1], [0, 0, 1, 1], [], []>} : vector<16x128xf32>, vector<128x128xf32>, vector<16x128xf32> -> vector<16x128xf32>
      %c0_17 = arith.constant 0 : index
      %c0_18 = arith.constant 0 : index
      %23 = vector.load %arg4[%c0_17, %c0_18] : memref<16x128xf32, #tpu.memory_space<vmem>>, vector<16x128xf32>
      tpu.vector_store %arg4[%c0_17, %c0_18], %22 {strides = array<i32>} : memref<16x128xf32, #tpu.memory_space<vmem>>, vector<16x128xf32>,
    } else {
    }
    return
  }
  func.func @transform_0(%arg0: i32) -> (i32, i32) {
    %c0_i32 = arith.constant 0 : i32
    %c0_i32_0 = arith.constant 0 : i32
    return %c0_i32, %arg0 : i32, i32
  }
  func.func @transform_1(%arg0: i32) -> (i32, i32) {
    %c0_i32 = arith.constant 0 : i32
    %c0_i32_0 = arith.constant 0 : i32
    return %arg0, %c0_i32 : i32, i32
  }
  func.func @transform_2(%arg0: i32) -> (i32, i32) {
    %c0_i32 = arith.constant 0 : i32
    %c0_i32_0 = arith.constant 0 : i32
    %c0_i32_1 = arith.constant 0 : i32
    return %c0_i32, %c0_i32_0 : i32, i32
  }
  func.func @transform_3(%arg0: i32) -> (i32, i32) {
    %c0_i32 = arith.constant 0 : i32
    %c0_i32_0 = arith.constant 0 : i32
    %c0_i32_1 = arith.constant 0 : i32
    return %c0_i32, %c0_i32_0 : i32, i32
  }
}

</mosaic_0001>

<bundles_post_ra>
// kernel: tpu_custom_call.1
= control target key start
LH: loop header
LB: loop body
LE: loop exit
PB: predicated region body
PF: predicated region fallthrough
CT: control target
= control target key end

     0   :  { %8 = vsyncpa [#allocation4], 0  ;;  %s1422_s0 = inlined_call_operand.hbm [shape: bf16[16,1024], index: 0, kind: input, shape index: {}]   ;;  %s1423_s1 = inlined_call_operand.hbm [shape: bf16[1024,128], index: 1, kind: input, shape index: {}]   ;;  %s1424_s2 = inlined_call_operand.hbm [shape: f32[128,128], index: 2, kind: input, shape index: {}]   ;;  %s1425_s3 = inlined_call_operand.hbm [shape: f32[16,128], index: 3, kind: output, shape index: {}]  }
   0x1   :  { %9 = vsyncpa [#allocation7], 0 }
   0x2   :  { %10 = vsyncpa [#allocation5], 0  ;;  %s1338_s12 = smov [#allocation6]   ;;  %s1244_s16 = scalar_lea.hbm %s1423_s1, 8192 }
   0x3   :  { %s28_s13 = sshll.u32 %s1338_s12, 4  ;;  %p1245_p0 = scmp.ne.s32.totalorder %s1423_s1, %s1244_s16  ;;  %s29_s13 = int_to_ptr.vmem [resolvable:$true] %s28_s13 }
   0x4   :  { %p1248_p1 = scmp.lt.u32.totalorder %s1244_s16, %s1423_s1 }
   0x6   :  { %p1250_p2 = pnand %p1248_p1, %p1245_p0 }
   0x8   :  { %1253 = shalt.err (!%p1250_p2)
}
   0x9   :  { %s1254_s21 = scalar_lea.vmem %s29_s13, 8192  ;;  %p1259_p4 = scmp.lt.s32.totalorder %s29_s13, %s29_s13 }
   0xa   :  { %p1255_p3 = scmp.ne.s32.totalorder %s29_s13, %s1254_s21  ;;  %p1260_p5 = scmp.lt.s32.totalorder %s1254_s21, %s1254_s21 }
   0xc   :  { %p1261_p6 = por %p1260_p5, %p1259_p4 }
   0xe   :  { %p1262_p7 = pnand %p1261_p6, %p1255_p3 }
  0x10   :  { %1265 = shalt.err (!%p1262_p7)
}
  0x11   :  { %s1339_s22 = smov 64   ;;  %s1340_s23 = smov 4  }
  0x12   :  { %34 = dma.hbm_to_vmem [thread:$0]  %s1423_s1, 8192, %s29_s13, [#allocation7], %s1339_s22, %s1339_s22, %s1340_s23  }
  0x13   :  { %s1341_s26 = smov [#allocation3]   ;;  %s1266_s30 = scalar_lea.hbm %s1422_s0, 1024 }
  0x14   :  { %s16_s27 = sshll.u32 %s1341_s26, 4  ;;  %p1267_p8 = scmp.ne.s32.totalorder %s1422_s0, %s1266_s30  ;;  %s17_s27 = int_to_ptr.vmem [resolvable:$true] %s16_s27 }
  0x15   :  { %p1270_p9 = scmp.lt.u32.totalorder %s1266_s30, %s1422_s0 }
  0x17   :  { %p1272_p10 = pnand %p1270_p9, %p1267_p8 }
  0x19   :  { %1275 = shalt.err (!%p1272_p10)
}
  0x1a   :  { %s1276_s8 = scalar_lea.vmem %s17_s27, 1024  ;;  %p1281_p12 = scmp.lt.s32.totalorder %s17_s27, %s17_s27 }
  0x1b   :  { %p1277_p11 = scmp.ne.s32.totalorder %s17_s27, %s1276_s8  ;;  %p1282_p13 = scmp.lt.s32.totalorder %s1276_s8, %s1276_s8 }
  0x1d   :  { %p1283_p0 = por %p1282_p13, %p1281_p12 }
  0x1f   :  { %p1284_p1 = pnand %p1283_p0, %p1277_p11 }
  0x21   :  { %1287 = shalt.err (!%p1284_p1)
}
  0x22   :  { %s1342_s1 = smov 512   ;;  %s1343_s9 = smov 32  }
  0x23   :  { %22 = dma.hbm_to_vmem [thread:$0]  %s1422_s0, 1024, %s17_s27, [#allocation4], %s1342_s1, %s1342_s1, %s1343_s9  }
  0x24   :  { %s1344_s12 = smov [#allocation8]   ;;  %s1288_s16 = scalar_lea.hbm %s1424_s2, 2048 }
  0x25   :  { %s40_s13 = sshll.u32 %s1344_s12, 4  ;;  %p1289_p2 = scmp.ne.s32.totalorder %s1424_s2, %s1288_s16  ;;  %s41_s13 = int_to_ptr.vmem [resolvable:$true] %s40_s13 }
  0x26   :  { %p1292_p3 = scmp.lt.u32.totalorder %s1288_s16, %s1424_s2 }
  0x28   :  { %p1294_p4 = pnand %p1292_p3, %p1289_p2 }
  0x2a   :  { %1297 = shalt.err (!%p1294_p4)
}
  0x2b   :  { %s1298_s21 = scalar_lea.vmem %s41_s13, 2048  ;;  %p1303_p6 = scmp.lt.s32.totalorder %s41_s13, %s41_s13 }
  0x2c   :  { %p1299_p5 = scmp.ne.s32.totalorder %s41_s13, %s1298_s21  ;;  %p1304_p7 = scmp.lt.s32.totalorder %s1298_s21, %s1298_s21 }
  0x2e   :  { %p1305_p8 = por %p1304_p7, %p1303_p6 }
  0x30   :  { %p1306_p9 = pnand %p1305_p8, %p1299_p5 }
  0x32   :  { %1309 = shalt.err (!%p1306_p9)
}
  0x33   :  { %s1345_s0 = smov 128   ;;  %s1346_s22 = smov 8  }
  0x34   :  { %46 = dma.hbm_to_vmem [thread:$0]  %s1424_s2, 2048, %s41_s13, [#allocation7], %s1345_s0, %s1345_s0, %s1346_s22  }
  0x35   :  { %1332 = dma.done.wait [#allocation4], 1024  }
  0x36   :  { %1333 = vsyncadd [#allocation4], 4294966272 }
  0x37   :  { %1334 = dma.done.wait [#allocation7], 10240  }
  0x38   :  { %1335 = vsyncadd [#allocation7], 4294957056  ;;  %v1176_v0 = vld [vmem:[#allocation6 + $0x40] sm:$0xff]   ;;  %v1180_v4 = vld [vmem:[#allocation6 + $0x48] sm:$0xff]   ;;  %s1347_s2 = smov [#allocation9]  }
  0x39   :  { %v1177_v1 = vld [vmem:[#allocation6 + $0xc0] sm:$0xff]   ;;  %993 = vmatprep.subr.bf16.mxu0 %v1176_v0  ;;  %v1181_v5 = vld [vmem:[#allocation6 + $0xc8] sm:$0xff]   ;;  %v1184_v8 = vld [vmem:[#allocation6 + $0x50] sm:$0xff]   ;;  %s908_s25 = sshll.u32 %s1347_s2, 4  ;;  %s909_s25 = int_to_ptr.vmem [resolvable:$true] %s908_s25 }
  0x3a   :  { %v1178_v2 = vld [vmem:[#allocation6] sm:$0xff]   ;;  %1015 = vmatprep.subr.bf16.mxu1 %v1177_v1  ;;  %v1182_v6 = vld [vmem:[#allocation6 + $0x8] sm:$0xff]   ;;  %v1185_v9 = vld [vmem:[#allocation6 + $0xd0] sm:$0xff]   ;;  %s1310_s26 = scalar_lea.vmem %s909_s25, 256  ;;  %p1315_p11 = scmp.lt.s32.totalorder %s909_s25, %s909_s25 }
  0x3b   :  { %v1179_v3 = vld [vmem:[#allocation6 + $0x80] sm:$0xff]   ;;  %994 = vmatpush3.bf16.msra.mxu0 %v1178_v2  ;;  %v1183_v7 = vld [vmem:[#allocation6 + $0x88] sm:$0xff]   ;;  %v1186_v10 = vld [vmem:[#allocation6 + $0x10] sm:$0xff]   ;;  %p1311_p10 = scmp.ne.s32.totalorder %s909_s25, %s1310_s26  ;;  %p1316_p12 = scmp.lt.s32.totalorder %s1310_s26, %s1310_s26 }
  0x3c   :  { %1016 = vmatpush3.bf16.msra.mxu1 %v1179_v3  ;;  %995 = vmatprep.subr.bf16.mxu0 %v1180_v4  ;;  %v1187_v11 = vld [vmem:[#allocation6 + $0x90] sm:$0xff]   ;;  %v1188_v12 = vld [vmem:[#allocation6 + $0x58] sm:$0xff]   ;;  %v1192_v16 = vld [vmem:[#allocation6 + $0x60] sm:$0xff]  }
  0x3d   :  { %1017 = vmatprep.subr.bf16.mxu1 %v1181_v5  ;;  %v1189_v13 = vld [vmem:[#allocation6 + $0xd8] sm:$0xff]   ;;  %v1193_v17 = vld [vmem:[#allocation6 + $0xe0] sm:$0xff]   ;;  %v1196_v20 = vld [vmem:[#allocation6 + $0x68] sm:$0xff]   ;;  %p1317_p13 = por %p1316_p12, %p1315_p11 }
  0x3e   :  { %v1190_v14 = vld [vmem:[#allocation6 + $0x18] sm:$0xff]   ;;  %v1194_v18 = vld [vmem:[#allocation6 + $0x20] sm:$0xff]   ;;  %v1197_v21 = vld [vmem:[#allocation6 + $0xe8] sm:$0xff]  }
  0x3f   :  { %996 = vmatpush3.bf16.msra.mxu0 %v1182_v6  ;;  %v1191_v15 = vld [vmem:[#allocation6 + $0x98] sm:$0xff]   ;;  %v1195_v19 = vld [vmem:[#allocation6 + $0xa0] sm:$0xff]   ;;  %v1198_v22 = vld [vmem:[#allocation6 + $0x28] sm:$0xff]   ;;  %p1318_p0 = pnand %p1317_p13, %p1311_p10 }
  0x40   :  { %1018 = vmatpush3.bf16.msra.mxu1 %v1183_v7  ;;  %997 = vmatprep.subr.bf16.mxu0 %v1184_v8  ;;  %v1199_v23 = vld [vmem:[#allocation6 + $0xa8] sm:$0xff]   ;;  %v1200_v24 = vld [vmem:[#allocation6 + $0x70] sm:$0xff]   ;;  %v1204_v28 = vld [vmem:[#allocation6 + $0x78] sm:$0xff]  }
  0x41   :  { %1019 = vmatprep.subr.bf16.mxu1 %v1185_v9  ;;  %v1201_v25 = vld [vmem:[#allocation6 + $0xf0] sm:$0xff]   ;;  %v1205_v29 = vld [vmem:[#allocation6 + $0xf8] sm:$0xff]   ;;  %v65_v32 = vld [vmem:[#allocation3] sm:$0xff] }
  0x42   :  { %v1202_v26 = vld [vmem:[#allocation6 + $0x30] sm:$0xff]   ;;  %v1206_v30 = vld [vmem:[#allocation6 + $0x38] sm:$0xff]   ;;  %v69_v33 = vld [vmem:[#allocation3 + $0x20] sm:$0xff] }
  0x43   :  { %998 = vmatpush3.bf16.msra.mxu0 %v1186_v10  ;;  %v1203_v27 = vld [vmem:[#allocation6 + $0xb0] sm:$0xff]   ;;  %v1207_v31 = vld [vmem:[#allocation6 + $0xb8] sm:$0xff]   ;;  %v66_v34 = vld [vmem:[#allocation3 + $0x8] sm:$0xff]  ;;  %v921_v35 = vcombine.low %v65_v32, %v69_v33  ;;  %v922_v36 = vcombine.high %v65_v32, %v69_v33 }
  0x44   :  { %1020 = vmatpush3.bf16.msra.mxu1 %v1187_v11  ;;  %999 = vmatprep.subr.bf16.mxu0 %v1188_v12  ;;  %v70_v37 = vld [vmem:[#allocation3 + $0x28] sm:$0xff]  ;;  %v1208_v40 = vld [vmem:[#allocation6 + $0x140] sm:$0xff]   ;;  %v1216_v48 = vld [vmem:[#allocation6 + $0x150] sm:$0xff]  }
  0x45   :  { %1021 = vmatprep.subr.bf16.mxu1 %v1189_v13  ;;  %v923_v38 = vcombine.low %v66_v34, %v70_v37  ;;  %v924_v39 = vcombine.high %v66_v34, %v70_v37  ;;  %657 = vmatprep.mubr.bf16.mxu0 %v922_v36  ;;  %v1209_v41 = vld [vmem:[#allocation6 + $0x1c0] sm:$0xff]   ;;  %v1212_v44 = vld [vmem:[#allocation6 + $0x148] sm:$0xff]   ;;  %v1217_v49 = vld [vmem:[#allocation6 + $0x1d0] sm:$0xff]  }
  0x46   :  { %v1210_v42 = vld [vmem:[#allocation6 + $0x100] sm:$0xff]   ;;  %v1213_v45 = vld [vmem:[#allocation6 + $0x1c8] sm:$0xff]   ;;  %v1218_v50 = vld [vmem:[#allocation6 + $0x110] sm:$0xff]  }
  0x47   :  { %1000 = vmatpush3.bf16.msra.mxu0 %v1190_v14  ;;  %698 = vmatprep.mubr.bf16.mxu1 %v924_v39  ;;  %v1211_v43 = vld [vmem:[#allocation6 + $0x180] sm:$0xff]   ;;  %v1214_v46 = vld [vmem:[#allocation6 + $0x108] sm:$0xff]   ;;  %v1219_v51 = vld [vmem:[#allocation6 + $0x190] sm:$0xff]  }
  0x48   :  { %1022 = vmatpush3.bf16.msra.mxu1 %v1191_v15  ;;  %1001 = vmatprep.subr.bf16.mxu0 %v1192_v16  ;;  %v1215_v47 = vld [vmem:[#allocation6 + $0x188] sm:$0xff]   ;;  %v1220_v52 = vld [vmem:[#allocation6 + $0x158] sm:$0xff]   ;;  %v1224_v56 = vld [vmem:[#allocation6 + $0x160] sm:$0xff]  }
  0x49   :  { %1023 = vmatprep.subr.bf16.mxu1 %v1193_v17  ;;  %v1221_v53 = vld [vmem:[#allocation6 + $0x1d8] sm:$0xff]   ;;  %v1225_v57 = vld [vmem:[#allocation6 + $0x1e0] sm:$0xff]   ;;  %v1228_v60 = vld [vmem:[#allocation6 + $0x168] sm:$0xff]  }
  0x4a   :  { %v1222_v54 = vld [vmem:[#allocation6 + $0x118] sm:$0xff]   ;;  %v1226_v58 = vld [vmem:[#allocation6 + $0x120] sm:$0xff]   ;;  %v1229_v61 = vld [vmem:[#allocation6 + $0x1e8] sm:$0xff]  }
  0x4b   :  { %1002 = vmatpush3.bf16.msra.mxu0 %v1194_v18  ;;  %v1223_v55 = vld [vmem:[#allocation6 + $0x198] sm:$0xff]   ;;  %v1227_v59 = vld [vmem:[#allocation6 + $0x1a0] sm:$0xff]   ;;  %v1230_v62 = vld [vmem:[#allocation6 + $0x128] sm:$0xff]  }
  0x4c   :  { %1024 = vmatpush3.bf16.msra.mxu1 %v1195_v19  ;;  %1003 = vmatprep.subr.bf16.mxu0 %v1196_v20  ;;  %v1231_v63 = vld [vmem:[#allocation6 + $0x1a8] sm:$0xff]   ;;  %v1232_v0 = vld [vmem:[#allocation6 + $0x170] sm:$0xff]   ;;  %v1236_v4 = vld [vmem:[#allocation6 + $0x178] sm:$0xff]  }
  0x4d   :  { %1025 = vmatprep.subr.bf16.mxu1 %v1197_v21  ;;  %v1233_v1 = vld [vmem:[#allocation6 + $0x1f0] sm:$0xff]   ;;  %v1237_v5 = vld [vmem:[#allocation6 + $0x1f8] sm:$0xff]   ;;  %v810_v16 = vld [vmem:[#allocation8] sm:$0xff] }
  0x4e   :  { %v1234_v2 = vld [vmem:[#allocation6 + $0x130] sm:$0xff]   ;;  %v1238_v6 = vld [vmem:[#allocation6 + $0x138] sm:$0xff]   ;;  %v811_v17 = vld [vmem:[#allocation8 + $0x8] sm:$0xff] }
  0x4f   :  { %1004 = vmatpush3.bf16.msra.mxu0 %v1198_v22  ;;  %v1235_v3 = vld [vmem:[#allocation6 + $0x1b0] sm:$0xff]   ;;  %v1239_v7 = vld [vmem:[#allocation6 + $0x1b8] sm:$0xff]   ;;  %v1134_v19 = vpack.c.bf16 %v811_v17, %v810_v16  ;;  %v814_v22 = vld [vmem:[#allocation8 + $0x20] sm:$0xff] }
  0x50   :  { %1026 = vmatpush3.bf16.msra.mxu1 %v1199_v23  ;;  %1005 = vmatprep.subr.bf16.mxu0 %v1200_v24  ;;  %v67_v8 = vld [vmem:[#allocation3 + $0x10] sm:$0xff]  ;;  %v68_v12 = vld [vmem:[#allocation3 + $0x18] sm:$0xff]  ;;  %v815_v23 = vld [vmem:[#allocation8 + $0x28] sm:$0xff] }
  0x51   :  { %1027 = vmatprep.subr.bf16.mxu1 %v1201_v25  ;;  %v71_v9 = vld [vmem:[#allocation3 + $0x30] sm:$0xff]  ;;  %v72_v13 = vld [vmem:[#allocation3 + $0x38] sm:$0xff]  ;;  %v1142_v24 = vpack.c.bf16 %v815_v23, %v814_v22 }
  0x52   :  { %v925_v10 = vcombine.low %v67_v8, %v71_v9  ;;  %v926_v11 = vcombine.high %v67_v8, %v71_v9  ;;  %v927_v14 = vcombine.low %v68_v12, %v72_v13  ;;  %v928_v15 = vcombine.high %v68_v12, %v72_v13  ;;  %v812_v18 = vld [vmem:[#allocation8 + $0x10] sm:$0xff]  ;;  %v813_v20 = vld [vmem:[#allocation8 + $0x18] sm:$0xff] }
  0x53   :  { %1006 = vmatpush3.bf16.msra.mxu0 %v1202_v26  ;;  %v1138_v21 = vpack.c.bf16 %v813_v20, %v812_v18  ;;  %v816_v25 = vld [vmem:[#allocation8 + $0x30] sm:$0xff]  ;;  %v817_v26 = vld [vmem:[#allocation8 + $0x38] sm:$0xff] }
  0x54   :  { %1028 = vmatpush3.bf16.msra.mxu1 %v1203_v27  ;;  %1007 = vmatprep.subr.bf16.mxu0 %v1204_v28  ;;  %v1146_v27 = vpack.c.bf16 %v817_v26, %v816_v25 }
  0x55   :  { %1029 = vmatprep.subr.bf16.mxu1 %v1205_v29 }
  0x57   :  { %1008 = vmatpush3.bf16.msra.mxu0 %v1206_v30 }
  0x58   :  { %1030 = vmatpush3.bf16.msra.mxu1 %v1207_v31  ;;  %1037 = vmatprep.subr.bf16.mxu0 %v1208_v40 }
  0x59   :  { %1059 = vmatprep.subr.bf16.mxu1 %v1209_v41 }
  0x5a   :  { %658 = vmatmul.mubr.bf16.vlgmr.msra.gmra.mrb[0].mxu0 %v921_v35 }
  0x5b   :  { %699 = vmatmul.mubr.bf16.vlgmr.msra.gmra.mrb[0].mxu1 %v923_v38  ;;  %1038 = vmatpush3.bf16.msra.mxu0 %v1210_v42 }
  0x5c   :  { %1060 = vmatpush3.bf16.msra.mxu1 %v1211_v43  ;;  %1039 = vmatprep.subr.bf16.mxu0 %v1212_v44 }
  0x5d   :  { %1061 = vmatprep.subr.bf16.mxu1 %v1213_v45  ;;  %739 = vmatprep.mubr.bf16.mxu0 %v926_v11 }
  0x5e   :  { %780 = vmatprep.mubr.bf16.mxu1 %v928_v15 }
  0x5f   :  { %1040 = vmatpush3.bf16.msra.mxu0 %v1214_v46 }
  0x60   :  { %1062 = vmatpush3.bf16.msra.mxu1 %v1215_v47  ;;  %1041 = vmatprep.subr.bf16.mxu0 %v1216_v48 }
  0x61   :  { %1063 = vmatprep.subr.bf16.mxu1 %v1217_v49 }
  0x63   :  { %1042 = vmatpush3.bf16.msra.mxu0 %v1218_v50 }
  0x64   :  { %1064 = vmatpush3.bf16.msra.mxu1 %v1219_v51  ;;  %1043 = vmatprep.subr.bf16.mxu0 %v1220_v52 }
  0x65   :  { %1065 = vmatprep.subr.bf16.mxu1 %v1221_v53 }
  0x67   :  { %1044 = vmatpush3.bf16.msra.mxu0 %v1222_v54 }
  0x68   :  { %1066 = vmatpush3.bf16.msra.mxu1 %v1223_v55  ;;  %1045 = vmatprep.subr.bf16.mxu0 %v1224_v56 }
  0x69   :  { %1067 = vmatprep.subr.bf16.mxu1 %v1225_v57 }
  0x6b   :  { %1046 = vmatpush3.bf16.msra.mxu0 %v1226_v58 }
  0x6c   :  { %1068 = vmatpush3.bf16.msra.mxu1 %v1227_v59  ;;  %1047 = vmatprep.subr.bf16.mxu0 %v1228_v60  ;;  %v818_v60 = vld [vmem:[#allocation8 + $0x40] sm:$0xff] }
  0x6d   :  { %1069 = vmatprep.subr.bf16.mxu1 %v1229_v61  ;;  %v819_v61 = vld [vmem:[#allocation8 + $0x48] sm:$0xff] }
  0x6f   :  { %1048 = vmatpush3.bf16.msra.mxu0 %v1230_v62  ;;  %v1150_v62 = vpack.c.bf16 %v819_v61, %v818_v60 }
  0x70   :  { %1070 = vmatpush3.bf16.msra.mxu1 %v1231_v63  ;;  %1049 = vmatprep.subr.bf16.mxu0 %v1232_v0  ;;  %v820_v63 = vld [vmem:[#allocation8 + $0x50] sm:$0xff]  ;;  %v821_v0 = vld [vmem:[#allocation8 + $0x58] sm:$0xff] }
  0x71   :  { %1071 = vmatprep.subr.bf16.mxu1 %v1233_v1  ;;  %v1154_v1 = vpack.c.bf16 %v821_v0, %v820_v63 }
  0x73   :  { %1050 = vmatpush3.bf16.msra.mxu0 %v1234_v2  ;;  %v822_v2 = vld [vmem:[#allocation8 + $0x60] sm:$0xff] }
  0x74   :  { %1072 = vmatpush3.bf16.msra.mxu1 %v1235_v3  ;;  %1051 = vmatprep.subr.bf16.mxu0 %v1236_v4  ;;  %v823_v3 = vld [vmem:[#allocation8 + $0x68] sm:$0xff] }
  0x75   :  { %1073 = vmatprep.subr.bf16.mxu1 %v1237_v5  ;;  %v1158_v4 = vpack.c.bf16 %v823_v3, %v822_v2  ;;  %v824_v5 = vld [vmem:[#allocation8 + $0x70] sm:$0xff] }
  0x77   :  { %1052 = vmatpush3.bf16.msra.mxu0 %v1238_v6  ;;  %v825_v6 = vld [vmem:[#allocation8 + $0x78] sm:$0xff] }
  0x78   :  { %1074 = vmatpush3.bf16.msra.mxu1 %v1239_v7  ;;  %1135 = vmatprep.subr.bf16.mxu0 %v1134_v19  ;;  %v1162_v7 = vpack.c.bf16 %v825_v6, %v824_v5 }
  0x7a   :  { %740 = vmatmul.mubr.bf16.vlgmr.msra.gmra.mrb[4].mxu0 %v925_v10 }
  0x7b   :  { %781 = vmatmul.mubr.bf16.vlgmr.msra.gmra.mrb[4].mxu1 %v927_v14  ;;  %1137 = vmatpush3.bf16.msra.mxu0 %v1134_v19 }
  0x7c   :  { %1139 = vmatprep.subr.bf16.mxu0 %v1138_v21 }
  0x7f   :  { %1141 = vmatpush3.bf16.msra.mxu0 %v1138_v21 }
  0x80   :  { %1143 = vmatprep.subr.bf16.mxu0 %v1142_v24 }
  0x83   :  { %1145 = vmatpush3.bf16.msra.mxu0 %v1142_v24 }
  0x84   :  { %1147 = vmatprep.subr.bf16.mxu0 %v1146_v27 }
  0x87   :  { %1149 = vmatpush3.bf16.msra.mxu0 %v1146_v27 }
  0x88   :  { %1151 = vmatprep.subr.bf16.mxu0 %v1150_v62 }
  0x8b   :  { %1153 = vmatpush3.bf16.msra.mxu0 %v1150_v62 }
  0x8c   :  { %1155 = vmatprep.subr.bf16.mxu0 %v1154_v1 }
  0x8f   :  { %1157 = vmatpush3.bf16.msra.mxu0 %v1154_v1 }
  0x90   :  { %1159 = vmatprep.subr.bf16.mxu0 %v1158_v4 }
  0x93   :  { %1161 = vmatpush3.bf16.msra.mxu0 %v1158_v4 }
  0x94   :  { %1163 = vmatprep.subr.bf16.mxu0 %v1162_v7 }
  0x97   :  { %1165 = vmatpush3.bf16.msra.mxu0 %v1162_v7 }
 0x12d   :  { %v1009_v28 = vpop.f32.mrb[0].mxu0 }
 0x12e   :  { %v1031_v29 = vpop.f32.mrb[0].mxu1  ;;  %v1010_v30 = vpop.f32.mrb[1].mxu0 }
 0x12f   :  { %v1011_v31 = vadd.f32 %v1010_v30, %v1009_v28  ;;  %v1032_v32 = vpop.f32.mrb[1].mxu1  ;;  %v1012_v33 = vpop.f32.mrb[2].mxu0 }
 0x130   :  { %v1033_v34 = vadd.f32 %v1032_v32, %v1031_v29  ;;  %v1034_v35 = vpop.f32.mrb[2].mxu1  ;;  %v1013_v36 = vpop.f32.mrb[3].mxu0 }
 0x131   :  { %v1014_v37 = vadd.f32 %v1013_v36, %v1012_v33  ;;  %v1035_v38 = vpop.f32.mrb[3].mxu1 }
 0x132   :  { %v701_v39 = vadd.f32 %v1033_v34, %v1011_v31  ;;  %v1036_v40 = vadd.f32 %v1035_v38, %v1034_v35 }
 0x134   :  { %v704_v41 = vadd.f32 %v1036_v40, %v1014_v37 }
 0x14d   :  { %v1053_v42 = vpop.f32.mrb[4].mxu0 }
 0x14e   :  { %v1075_v43 = vpop.f32.mrb[4].mxu1  ;;  %v1054_v44 = vpop.f32.mrb[5].mxu0 }
 0x14f   :  { %v1055_v45 = vadd.f32 %v1054_v44, %v1053_v42  ;;  %v1076_v46 = vpop.f32.mrb[5].mxu1  ;;  %v1056_v47 = vpop.f32.mrb[6].mxu0 }
 0x150   :  { %v1077_v48 = vadd.f32 %v1076_v46, %v1075_v43  ;;  %v1078_v49 = vpop.f32.mrb[6].mxu1  ;;  %v1057_v50 = vpop.f32.mrb[7].mxu0 }
 0x151   :  { %v742_v51 = vadd.f32 %v1055_v45, %v701_v39  ;;  %v1058_v52 = vadd.f32 %v1057_v50, %v1056_v47  ;;  %v1079_v53 = vpop.f32.mrb[7].mxu1 }
 0x152   :  { %v1080_v54 = vadd.f32 %v1079_v53, %v1078_v49 }
 0x153   :  { %v745_v55 = vadd.f32 %v1058_v52, %v704_v41  ;;  %v783_v56 = vadd.f32 %v1077_v48, %v742_v51 }
 0x155   :  { %v786_v57 = vadd.f32 %v1080_v54, %v745_v55  ;;  %v798_v58 = vmul.f32 %v783_v56, %v783_v56 }
 0x157   :  { %800 = vadd.xlane.f32.xlu0 %v798_v58  ;;  %v799_v59 = vmul.f32 %v786_v57, %v786_v57 }
 0x15b   :  { %802 = vadd.xlane.f32.xlu0 %v799_v59 }
 0x1e4   :  { %v801_v8 = vpop.xlane.xlu0 %800 }
 0x1e5   :  { %v804_v9 = vmax.f32 %v801_v8, 1e-24 }
 0x1e7   :  { %1240 = vrsqrt.f32 %v804_v9 }
 0x1e8   :  { %v803_v10 = vpop.xlane.xlu0 %802 }
 0x1e9   :  { %v805_v11 = vmax.f32 %v803_v10, 1e-24 }
 0x1eb   :  { %1242 = vrsqrt.f32 %v805_v11 }
 0x1f1   :  { %v1241_v12 = vpop.eup %1240 }
 0x1f2   :  { %v808_v13 = vmul.f32 %v1241_v12, %v783_v56 }
 0x1f4   :  { %1131 = vmatprep.mubr.f32.mxu0 %v808_v13 }
 0x1f5   :  { %v1243_v14 = vpop.eup %1242 }
 0x1f6   :  { %v809_v15 = vmul.f32 %v1243_v14, %v786_v57 }
 0x1f8   :  { %1132 = vmatmul.mubr.f32.vlgmr.msra.gmra.mrb[8].mxu0 %v809_v15 }
 0x2cb   :  { %v1133_v16 = vpop.f32.mrb[8].mxu0 }
 0x2cc   :  { %902 = vst [vmem:[#allocation9 + $0x8] sm:$0xff] %v1133_v16  ;;  %v892_v17 = vpop.f32.mrb[9].mxu0 }
 0x2cd   :  { %901 = vst [vmem:[#allocation9] sm:$0xff] %v892_v17 }
 0x2ce   :  { %1321 = shalt.err (!%p1318_p0)
}
 0x2cf   :  { %s1322_s29 = scalar_lea.hbm %s1425_s3, 256 }
 0x2d0   :  { %p1323_p1 = scmp.ne.s32.totalorder %s1425_s3, %s1322_s29  ;;  %p1326_p2 = scmp.lt.u32.totalorder %s1322_s29, %s1425_s3 }
 0x2d2   :  { %p1328_p3 = pnand %p1326_p2, %p1323_p1 }
 0x2d4   :  { %1331 = shalt.err (!%p1328_p3)
}
 0x2d5   :  { %914 = dma.vmem_to_hbm [thread:$0]  %s909_s25, 256, %s1425_s3, [#allocation5], %s1345_s0, %s1345_s0, %s1346_s22  }
 0x2d6   :  { %1336 = dma.done.wait [#allocation5], 256  }
 0x2d7   :  { %1337 = vsyncadd [#allocation5], 4294967040 }
 0x2d8   :  { %918 = vsyncpa [#allocation4], 1 }
 0x2d9   :  { %919 = vsyncpa [#allocation7], 1 }
 0x2da   :  { %920 = vsyncpa [#allocation5], 1 }

</bundles_post_ra>
